<compile_context>
chip_gen: v7x
topology: tpu7x:2x2x1
jax: 0.10.0
libtpu: 0.0.40
codegen_flags: <defaults>
</compile_context>

<pallas_src>
import jax
import jax.numpy as jnp
from jax.experimental import pallas as pl
from jax.experimental.pallas import tpu as pltpu

ALPHA = 0.25
GAMMA = 2.0
LANES = 128
BLOCK_ROWS = 1024  # 1024 x 128 f32 = 512 KiB input block (~85% of HBM roofline)


def _focal_partial_kernel(x_ref, t_ref, bce_out_ref, t_out_ref):
    p = x_ref[...].astype(jnp.float32)    # (tile_rows, 128) probabilities
    t = t_ref[...].astype(jnp.float32)    # bf16 storage -> f32 compute (v5e-safe)

    # One-log BCE with PyTorch's -100 clamp.  NOTE: `t > 0.5` mirrors the
    # truncation of targets.long() for binary {0,1} targets (the only values
    # focal loss / the alpha gather are defined on).  Zero padding (p=0, t=0)
    # selects 1-p=1 -> log(1)=0, i.e. contributes nothing to either sum.
    bce = -jnp.maximum(jnp.log(jnp.where(t > 0.5, p, 1.0 - p)), -100.0)

    rt = bce.shape[0] // 8
    # Fold rows into an (8,128) vreg-shaped partial sum: pure VPU adds.  The
    # single cross-lane reduction happens once, outside the kernel.
    bce_out_ref[0] = bce.reshape(rt, 8, LANES).sum(axis=0)
    t_out_ref[0] = t.reshape(rt, 8, LANES).sum(axis=0)


def weighted_focal_loss(inputs, targets, alpha=ALPHA, gamma=GAMMA,
                        block_rows=BLOCK_ROWS):
    """inputs: probabilities in (0,1); targets: {0,1} labels. Any shape (e.g. NCHW)."""
    n_elems = inputs.size
    rows = -(-n_elems // LANES)                 # ceil to full lanes
    rows8 = -(-rows // 8) * 8                   # sublane (8) alignment
    tile_rows = min(block_rows, rows8)          # adaptive: small inputs -> one tile
    padded_rows = -(-rows8 // tile_rows) * tile_rows
    pad = padded_rows * LANES - n_elems

    # Zero padding is exact-neutral for both accumulated sums (see kernel note).
    x2d = jnp.pad(jnp.ravel(inputs), (0, pad)).reshape(padded_rows, LANES)
    t2d = jnp.pad(jnp.ravel(targets).astype(jnp.bfloat16), (0, pad)).reshape(
        padded_rows, LANES)

    nblk = padded_rows // tile_rows

    bce_part, t_part = pl.pallas_call(
        _focal_partial_kernel,
        out_shape=(jax.ShapeDtypeStruct((nblk, 8, LANES), jnp.float32),
                   jax.ShapeDtypeStruct((nblk, 8, LANES), jnp.float32)),
        grid_spec=pltpu.PrefetchScalarGridSpec(
            num_scalar_prefetch=0,
            grid=(nblk,),
            in_specs=[
                pl.BlockSpec((tile_rows, LANES), lambda i: (i, 0)),
                pl.BlockSpec((tile_rows, LANES), lambda i: (i, 0)),
            ],
            out_specs=(
                pl.BlockSpec((1, 8, LANES), lambda i: (i, 0, 0)),
                pl.BlockSpec((1, 8, LANES), lambda i: (i, 0, 0)),
            ),
        ),
        compiler_params=pltpu.CompilerParams(
            dimension_semantics=("parallel",),   # independent blocks -> megacore OK
        ),
    )(x2d, t2d)

    # Finalize (tiny, runs once): combine per-block partials and apply the
    # scalar focal formula.
    inv_n = jnp.float32(1.0 / n_elems)
    bce_mean = jnp.sum(bce_part) * inv_n        # nn.BCELoss(reduction='mean')
    t_mean = jnp.sum(t_part) * inv_n
    # mean of alpha.gather(0, targets) for binary targets:
    at_mean = alpha + (1.0 - 2.0 * alpha) * t_mean
    pt = jnp.exp(-bce_mean)
    one_m_pt = 1.0 - pt
    focal = one_m_pt * one_m_pt if float(gamma) == 2.0 else one_m_pt ** gamma
    return at_mean * focal * bce_mean


def _reference(inputs, targets, alpha=ALPHA, gamma=GAMMA):
    """Pure-JAX PyTorch-faithful reference (two-log BCE + gather)."""
    p = inputs.astype(jnp.float32)
    t = targets.astype(jnp.float32)
    bce = -(t * jnp.maximum(jnp.log(p), -100.0)
            + (1.0 - t) * jnp.maximum(jnp.log(1.0 - p), -100.0))
    bce_mean = jnp.mean(bce)
    at = jnp.where(t.astype(jnp.int32) == 0, alpha, 1.0 - alpha)
    pt = jnp.exp(-bce_mean)
    return jnp.mean(at * (1.0 - pt) ** gamma * bce_mean)


if __name__ == "__main__":
    key = jax.random.PRNGKey(0)

    def _make(shape, k):
        k1, k2 = jax.random.split(k)
        inputs = jax.random.uniform(k1, shape, jnp.float32,
                                    minval=1e-4, maxval=1.0 - 1e-4)
        targets = (jax.random.uniform(k2, shape, jnp.float32) > 0.5).astype(
            jnp.float32)
        return inputs, targets

    shapes = [
        (2, 4, 16, 16),    # NCHW, 2048 elems (lane/sublane aligned)
        (2, 3, 7, 5),      # 210 elems (exercises padded tail)
        (2, 4, 128, 160),  # 163840 elems (exercises multi-block grid)
    ]
    keys = jax.random.split(key, len(shapes))
    for shape, k in zip(shapes, keys):
        inputs, targets = _make(shape, k)
        loss = jax.block_until_ready(weighted_focal_loss(inputs, targets))
        ref = jax.block_until_ready(_reference(inputs, targets))
        assert jnp.allclose(loss, ref, rtol=1e-5, atol=1e-6), (shape, loss, ref)

    print("KERNEL_OK")
</pallas_src>

<mosaic_0001>
module attributes {stable_mosaic.version = 11 : i64} {
  func.func @_focal_partial_kernel(%arg0: i32, %arg1: memref<16x128xf32, #tpu.memory_space<vmem>>, %arg2: memref<16x128xbf16, #tpu.memory_space<vmem>>, %arg3: memref<1x8x128xf32, #tpu.memory_space<vmem>>, %arg4: memref<1x8x128xf32, #tpu.memory_space<vmem>>) attributes {dimension_semantics = [#tpu.dimension_semantics<parallel>], iteration_bounds = array<i64: 1>, scalar_prefetch = 0 : i64, scratch_operands = 0 : i64, tpu.core_type = #tpu.core_type<tc>, window_params = [{transform_indices = @transform_0, window_bounds = array<i64: 16, 128>}, {transform_indices = @transform_1, window_bounds = array<i64: 16, 128>}, {transform_indices = @transform_2, window_bounds = array<i64: 1, 8, 128>}, {transform_indices = @transform_3, window_bounds = array<i64: 1, 8, 128>}]} {
    %c0 = arith.constant 0 : index
    %c0_0 = arith.constant 0 : index
    %0 = vector.load %arg1[%c0, %c0_0] : memref<16x128xf32, #tpu.memory_space<vmem>>, vector<16x128xf32>
    %c0_1 = arith.constant 0 : index
    %c0_2 = arith.constant 0 : index
    %1 = vector.load %arg2[%c0_1, %c0_2] : memref<16x128xbf16, #tpu.memory_space<vmem>>, vector<16x128xbf16>
    %2 = arith.extf %1 : vector<16x128xbf16> to vector<16x128xf32>
    %cst = arith.constant 5.000000e-01 : f32
    %3 = vector.broadcast %cst : f32 to vector<16x128xf32>
    %4 = arith.cmpf ogt, %2, %3 : vector<16x128xf32>
    %cst_3 = arith.constant 1.000000e+00 : f32
    %5 = vector.broadcast %cst_3 : f32 to vector<16x128xf32>
    %6 = arith.subf %5, %0 : vector<16x128xf32>
    %7 = arith.select %4, %0, %6 : vector<16x128xi1>, vector<16x128xf32>
    %8 = math.log %7 : vector<16x128xf32>
    %cst_4 = arith.constant -1.000000e+02 : f32
    %9 = vector.broadcast %cst_4 : f32 to vector<16x128xf32>
    %10 = arith.maximumf %8, %9 : vector<16x128xf32>
    %cst_5 = arith.constant 0.000000e+00 : f32
    %11 = vector.broadcast %cst_5 : f32 to vector<16x128xf32>
    %12 = arith.subf %11, %10 : vector<16x128xf32>
    %13 = vector.shape_cast %12 : vector<16x128xf32> to vector<2x8x128xf32>
    %cst_6 = arith.constant dense<0.000000e+00> : vector<8x128xf32>
    %14 = vector.multi_reduction <add>, %13, %cst_6 [0] : vector<2x8x128xf32> to vector<8x128xf32>
    %c0_7 = arith.constant 0 : index
    %c0_8 = arith.constant 0 : index
    %c0_9 = arith.constant 0 : index
    %15 = vector.load %arg3[%c0_7, %c0_8, %c0_9] : memref<1x8x128xf32, #tpu.memory_space<vmem>>, vector<1x8x128xf32>
    %16 = vector.shape_cast %15 : vector<1x8x128xf32> to vector<8x128xf32>
    %17 = vector.shape_cast %14 : vector<8x128xf32> to vector<1x8x128xf32>
    tpu.vector_store %arg3[%c0_7, %c0_8, %c0_9], %17 {strides = array<i32>} : memref<1x8x128xf32, #tpu.memory_space<vmem>>, vector<1x8x128xf32>,
    %18 = vector.shape_cast %2 : vector<16x128xf32> to vector<2x8x128xf32>
    %cst_10 = arith.constant dense<0.000000e+00> : vector<8x128xf32>
    %19 = vector.multi_reduction <add>, %18, %cst_10 [0] : vector<2x8x128xf32> to vector<8x128xf32>
    %c0_11 = arith.constant 0 : index
    %c0_12 = arith.constant 0 : index
    %c0_13 = arith.constant 0 : index
    %20 = vector.load %arg4[%c0_11, %c0_12, %c0_13] : memref<1x8x128xf32, #tpu.memory_space<vmem>>, vector<1x8x128xf32>
    %21 = vector.shape_cast %20 : vector<1x8x128xf32> to vector<8x128xf32>
    %22 = vector.shape_cast %19 : vector<8x128xf32> to vector<1x8x128xf32>
    tpu.vector_store %arg4[%c0_11, %c0_12, %c0_13], %22 {strides = array<i32>} : memref<1x8x128xf32, #tpu.memory_space<vmem>>, vector<1x8x128xf32>,
    return
  }
  func.func @transform_0(%arg0: i32) -> (i32, i32) {
    %c0_i32 = arith.constant 0 : i32
    %c0_i32_0 = arith.constant 0 : i32
    return %arg0, %c0_i32 : i32, i32
  }
  func.func @transform_1(%arg0: i32) -> (i32, i32) {
    %c0_i32 = arith.constant 0 : i32
    %c0_i32_0 = arith.constant 0 : i32
    return %arg0, %c0_i32 : i32, i32
  }
  func.func @transform_2(%arg0: i32) -> (i32, i32, i32) {
    %c0_i32 = arith.constant 0 : i32
    %c0_i32_0 = arith.constant 0 : i32
    %c0_i32_1 = arith.constant 0 : i32
    return %arg0, %c0_i32, %c0_i32_0 : i32, i32, i32
  }
  func.func @transform_3(%arg0: i32) -> (i32, i32, i32) {
    %c0_i32 = arith.constant 0 : i32
    %c0_i32_0 = arith.constant 0 : i32
    %c0_i32_1 = arith.constant 0 : i32
    return %arg0, %c0_i32, %c0_i32_0 : i32, i32, i32
  }
}

</mosaic_0001>

<bundles_post_ra>
// kernel: tpu_custom_call.1
= control target key start
LH: loop header
LB: loop body
LE: loop exit
PB: predicated region body
PF: predicated region fallthrough
CT: control target
= control target key end

     0   :  { %9 = vsyncpa [#allocation3], 0  ;;  %s285_s0 = inlined_call_operand.hbm [shape: f32[16,128], index: 0, kind: input, shape index: {}]   ;;  %s286_s1 = inlined_call_operand.hbm [shape: bf16[16,128], index: 1, kind: input, shape index: {}]   ;;  %s287_s2 = inlined_call_operand.hbm [shape: f32[1,8,128], index: 2, kind: output, shape index: {0}]   ;;  %s288_s3 = inlined_call_operand.hbm [shape: f32[1,8,128], index: 3, kind: output, shape index: {1}]  }
   0x1   :  { %10 = vsyncpa [#allocation6], 0 }
   0x2   :  { %11 = vsyncpa [#allocation4], 0 }
   0x3   :  { %12 = vsyncpa [#allocation9], 0  ;;  %s209_s12 = smov [#allocation2]   ;;  %s113_s16 = scalar_lea.hbm %s285_s0, 256 }
   0x4   :  { %s18_s13 = sshll.u32 %s209_s12, 4  ;;  %p114_p0 = scmp.ne.s32.totalorder %s285_s0, %s113_s16  ;;  %s19_s13 = int_to_ptr.vmem [resolvable:$true] %s18_s13 }
   0x5   :  { %p117_p1 = scmp.lt.u32.totalorder %s113_s16, %s285_s0 }
   0x7   :  { %p119_p2 = pnand %p117_p1, %p114_p0 }
   0x9   :  { %122 = shalt.err (!%p119_p2)
}
   0xa   :  { %s123_s21 = scalar_lea.vmem %s19_s13, 256  ;;  %p128_p4 = scmp.lt.s32.totalorder %s19_s13, %s19_s13 }
   0xb   :  { %p124_p3 = scmp.ne.s32.totalorder %s19_s13, %s123_s21  ;;  %p129_p5 = scmp.lt.s32.totalorder %s123_s21, %s123_s21 }
   0xd   :  { %p130_p6 = por %p129_p5, %p128_p4 }
   0xf   :  { %p131_p7 = pnand %p130_p6, %p124_p3 }
  0x11   :  { %134 = shalt.err (!%p131_p7)
}
  0x12   :  { %s210_s22 = smov 128   ;;  %s211_s23 = smov 8  }
  0x13   :  { %24 = dma.hbm_to_vmem [thread:$0]  %s285_s0, 256, %s19_s13, [#allocation3], %s210_s22, %s210_s22, %s211_s23  }
  0x14   :  { %s212_s26 = smov [#allocation5]   ;;  %s135_s30 = scalar_lea.hbm %s286_s1, 128 }
  0x15   :  { %s30_s27 = sshll.u32 %s212_s26, 4  ;;  %p136_p8 = scmp.ne.s32.totalorder %s286_s1, %s135_s30  ;;  %s31_s27 = int_to_ptr.vmem [resolvable:$true] %s30_s27 }
  0x16   :  { %p139_p9 = scmp.lt.u32.totalorder %s135_s30, %s286_s1 }
  0x18   :  { %p141_p10 = pnand %p139_p9, %p136_p8 }
  0x1a   :  { %144 = shalt.err (!%p141_p10)
}
  0x1b   :  { %s145_s8 = scalar_lea.vmem %s31_s27, 128  ;;  %p150_p12 = scmp.lt.s32.totalorder %s31_s27, %s31_s27 }
  0x1c   :  { %p146_p11 = scmp.ne.s32.totalorder %s31_s27, %s145_s8  ;;  %p151_p13 = scmp.lt.s32.totalorder %s145_s8, %s145_s8 }
  0x1e   :  { %p152_p0 = por %p151_p13, %p150_p12 }
  0x20   :  { %p153_p1 = pnand %p152_p0, %p146_p11 }
  0x22   :  { %156 = shalt.err (!%p153_p1)
}
  0x23   :  { %s213_s0 = smov 64   ;;  %s214_s9 = smov 4  }
  0x24   :  { %36 = dma.hbm_to_vmem [thread:$0]  %s286_s1, 128, %s31_s27, [#allocation6], %s213_s0, %s213_s0, %s214_s9  }
  0x25   :  { %201 = dma.done.wait [#allocation3], 256  }
  0x26   :  { %202 = vsyncadd [#allocation3], 4294967040 }
  0x27   :  { %203 = dma.done.wait [#allocation6], 128  }
  0x28   :  { %204 = vsyncadd [#allocation6], 4294967168  ;;  %v43_v0 = vld [vmem:[#allocation2] sm:$0xff]  ;;  %v44_v1 = vld [vmem:[#allocation2 + $0x8] sm:$0xff]  ;;  %s215_s12 = smov [#allocation8]  }
  0x29   :  { %v98_v2 = vld [vmem:[#allocation5] sm:$0xff]   ;;  %s83_s13 = sshll.u32 %s215_s12, 4  ;;  %v51_v5 = vsub.f32 1.0, %v43_v0  ;;  %v52_v6 = vsub.f32 1.0, %v44_v1  ;;  %s84_s13 = int_to_ptr.vmem [resolvable:$true] %s83_s13 }
  0x2a   :  { %v99_v3 = vunpack.c.l.bf16 %v98_v2  ;;  %v100_v4 = vunpack.c.h.bf16 %v98_v2  ;;  %s157_s1 = scalar_lea.vmem %s84_s13, 128  ;;  %p162_p3 = scmp.lt.s32.totalorder %s84_s13, %s84_s13 }
  0x2b   :  { %p158_p2 = scmp.ne.s32.totalorder %s84_s13, %s157_s1  ;;  %p163_p4 = scmp.lt.s32.totalorder %s157_s1, %s157_s1 }
  0x2c   :  { %vm49_vm0 = vcmp.gt.f32.partialorder %v99_v3, 0.5  ;;  %vm50_vm1 = vcmp.gt.f32.partialorder %v100_v4, 0.5  ;;  %v65_v7 = vadd.f32 %v100_v4, %v99_v3 }
  0x2d   :  { %v53_v8 = vsel %vm49_vm0, %v43_v0, %v51_v5  ;;  %v54_v9 = vsel %vm50_vm1, %v44_v1, %v52_v6  ;;  %p164_p5 = por %p163_p4, %p162_p3 }
  0x2e   :  { %109 = vlog2.f32 %v53_v8  ;;  %66 = vst [vmem:[#allocation8] sm:$0xff] %v65_v7 }
  0x2f   :  { %111 = vlog2.f32 %v54_v9  ;;  %p165_p6 = pnand %p164_p5, %p158_p2 }
  0x31   :  { %168 = shalt.err (!%p165_p6)
}
  0x32   :  { %s169_s16 = scalar_lea.hbm %s288_s3, 128 }
  0x33   :  { %p170_p7 = scmp.ne.s32.totalorder %s288_s3, %s169_s16  ;;  %p173_p8 = scmp.lt.u32.totalorder %s169_s16, %s288_s3 }
  0x35   :  { %p175_p9 = pnand %p173_p8, %p170_p7 }
  0x37   :  { %178 = shalt.err (!%p175_p9)
}
  0x38   :  { %86 = dma.vmem_to_hbm [thread:$0]  %s84_s13, 128, %s288_s3, [#allocation9]   ;;  %v110_v10 = vpop.eup %109 }
  0x39   :  { %v112_v11 = vpop.eup %111  ;;  %v56_v12 = vmul.f32 0.6931472, %v110_v10  ;;  %s216_s23 = smov [#allocation7]  }
  0x3a   :  { %v58_v13 = vmul.f32 0.6931472, %v112_v11  ;;  %s73_s24 = sshll.u32 %s216_s23, 4  ;;  %s74_s24 = int_to_ptr.vmem [resolvable:$true] %s73_s24 }
  0x3b   :  { %v59_v14 = vmax.f32 %v56_v12, -100.0  ;;  %s179_s25 = scalar_lea.vmem %s74_s24, 128  ;;  %p184_p11 = scmp.lt.s32.totalorder %s74_s24, %s74_s24 }
  0x3c   :  { %v60_v15 = vmax.f32 %v58_v13, -100.0  ;;  %p180_p10 = scmp.ne.s32.totalorder %s74_s24, %s179_s25  ;;  %p185_p12 = scmp.lt.s32.totalorder %s179_s25, %s179_s25 }
  0x3d   :  { %v61_v16 = vsub.f32 0.0, %v59_v14 }
  0x3e   :  { %v62_v17 = vsub.f32 0.0, %v60_v15  ;;  %p186_p13 = por %p185_p12, %p184_p11 }
  0x40   :  { %v63_v18 = vadd.f32 %v62_v17, %v61_v16  ;;  %p187_p0 = pnand %p186_p13, %p180_p10 }
  0x42   :  { %64 = vst [vmem:[#allocation7] sm:$0xff] %v63_v18 }
  0x43   :  { %190 = shalt.err (!%p187_p0)
}
  0x44   :  { %s191_s27 = scalar_lea.hbm %s287_s2, 128 }
  0x45   :  { %p192_p1 = scmp.ne.s32.totalorder %s287_s2, %s191_s27  ;;  %p195_p2 = scmp.lt.u32.totalorder %s191_s27, %s287_s2 }
  0x47   :  { %p197_p3 = pnand %p195_p2, %p192_p1 }
  0x49   :  { %200 = shalt.err (!%p197_p3)
}
  0x4a   :  { %76 = dma.vmem_to_hbm [thread:$0]  %s74_s24, 128, %s287_s2, [#allocation4]  }
  0x4b   :  { %205 = dma.done.wait [#allocation4], 128  }
  0x4c   :  { %206 = vsyncadd [#allocation4], 4294967168 }
  0x4d   :  { %207 = dma.done.wait [#allocation9], 128  }
  0x4e   :  { %208 = vsyncadd [#allocation9], 4294967168 }
  0x4f   :  { %93 = vsyncpa [#allocation3], 1 }
  0x50   :  { %94 = vsyncpa [#allocation6], 1 }
  0x51   :  { %95 = vsyncpa [#allocation4], 1 }
  0x52   :  { %96 = vsyncpa [#allocation9], 1 }

</bundles_post_ra>
